<compile_context>
chip_gen: v5e
topology: v5e:2x2
jax: 0.10.0
libtpu: 0.0.40
codegen_flags: <defaults>
</compile_context>

<pallas_src>
import jax
import jax.numpy as jnp
from jax.experimental import pallas as pl
from jax.experimental.pallas import tpu as pltpu

_MIB = 1024 * 1024


def _head_kernel(x_ref, w_ref, b_ref, o_ref):
    # x_ref: (tm, H)   w_ref: (H, L)   b_ref: (1, L)   o_ref: (tm, L)
    y = jnp.dot(x_ref[...], w_ref[...], preferred_element_type=jnp.float32)
    o_ref[...] = (y + b_ref[...].astype(jnp.float32)).astype(o_ref.dtype)


def _round_up(v, m):
    return ((v + m - 1) // m) * m


def _vmem_capacity_bytes():
    """Physical VMEM per TensorCore; conservative default if query fails."""
    try:
        return int(pltpu.get_tpu_info().vmem_capacity_bytes)
    except Exception:
        return 64 * _MIB  # v7x-sized conservative default


def _pick_tile_m(M, H, L, x_bytes, out_bytes, w_bytes, budget, const_buf):
    """Largest row tile fitting the VMEM budget, aligned, >=2 grid steps,
    preferring an exact divisor of M (no ragged tail block)."""
    row_align = 8 * max(1, 4 // x_bytes)  # 8 for f32, 16 for bf16, 32 for int8
    if M <= row_align:
        return M  # full-dim block is always legal

    fixed = const_buf * (H * L * w_bytes + L * w_bytes)
    max_tm = 2048
    while max_tm > row_align:
        need = fixed + 2 * max_tm * H * x_bytes + 2 * max_tm * L * out_bytes
        if need <= budget:
            break
        max_tm //= 2
    max_tm = max(max_tm, row_align)

    # Keep >=2 grid steps so both v7x TensorCores participate; the extra step
    # is ~0.35us on single-core parts, i.e. negligible.
    half = _round_up((M + 1) // 2, row_align)
    max_tm = min(max_tm, half)
    max_tm = max(row_align, (max_tm // row_align) * row_align)

    # Prefer a divisor of M so the last block isn't ragged.
    cand = max_tm
    while cand >= row_align:
        if M % cand == 0:
            return cand
        cand -= row_align
    return max_tm  # ragged tail is still correct (Pallas pads the block)


def token_classification_head(x, weight, bias, *, tile_m=None,
                              vmem_limit_bytes=None, training=False):
    """x: [B, S, H]; weight: [H, L] (pre-transposed); bias: [L]. Returns [B, S, L]."""
    if training:
        # TODO(synk): training-mode dropout not implemented in the kernel.
        raise NotImplementedError("TokenClassificationHead kernel is eval-mode only")

    B, S, H = x.shape
    L = weight.shape[1]
    M = B * S
    out_dtype = x.dtype

    x_bytes = jnp.dtype(x.dtype).itemsize
    w_bytes = jnp.dtype(weight.dtype).itemsize
    out_bytes = jnp.dtype(out_dtype).itemsize

    # Generation-aware VMEM budget.
    cap = _vmem_capacity_bytes()
    if vmem_limit_bytes is None:
        vmem_limit_bytes = max((cap * 3) // 4, 32 * _MIB)   # ~96 MiB on 128 MiB parts, ~48 MiB on v7x
    budget = max(vmem_limit_bytes - 16 * _MIB, 4 * _MIB)

    x2d = x.reshape(M, H)
    b2d = bias.reshape(1, L)

    cost = pl.CostEstimate(
        flops=2 * M * H * L,
        transcendentals=0,
        bytes_accessed=M * H * x_bytes + H * L * w_bytes + L * w_bytes + M * L * out_bytes,
    )

    def _call(tm, single_buffer_consts):
        const_kwargs = {"pipeline_mode": pl.Buffered(1)} if single_buffer_consts else {}
        grid = (pl.cdiv(M, tm),)
        return pl.pallas_call(
            _head_kernel,
            out_shape=jax.ShapeDtypeStruct((M, L), out_dtype),
            grid_spec=pltpu.PrefetchScalarGridSpec(
                num_scalar_prefetch=0,
                grid=grid,
                in_specs=[
                    pl.BlockSpec((tm, H), lambda i: (i, 0)),                  # token row tile
                    pl.BlockSpec((H, L), lambda i: (0, 0), **const_kwargs),   # full weight, resident
                    pl.BlockSpec((1, L), lambda i: (0, 0), **const_kwargs),   # bias row, resident
                ],
                out_specs=pl.BlockSpec((tm, L), lambda i: (i, 0)),            # L == full last dim
            ),
            compiler_params=pltpu.CompilerParams(
                dimension_semantics=("parallel",),
                vmem_limit_bytes=int(vmem_limit_bytes),
            ),
            cost_estimate=cost,
        )(x2d, weight, b2d)

    if tile_m is not None:
        tm = min(tile_m, M)
        try:
            out = _call(tm, True)
        except Exception:
            out = _call(tm, False)
    else:
        try:
            tm = _pick_tile_m(M, H, L, x_bytes, out_bytes, w_bytes, budget, const_buf=1)
            out = _call(tm, True)
        except Exception:
            # Fallback for JAX versions without pipeline_mode support: default
            # double-buffered constants, re-derive the tile under 2x weight cost.
            tm = _pick_tile_m(M, H, L, x_bytes, out_bytes, w_bytes, budget, const_buf=2)
            out = _call(tm, False)

    return out.reshape(B, S, L)


if __name__ == "__main__":
    # Small deterministic example: batch=2, seq=8, hidden=32, num_labels=8
    B, S, H, L = 2, 8, 32, 8
    key = jax.random.PRNGKey(0)
    kx, kw, kb = jax.random.split(key, 3)

    x = jax.random.normal(kx, (B, S, H), dtype=jnp.float32)
    # nn.Linear(hidden_size, num_labels): weight [L, H], bias [L].
    # Stored pre-transposed as [H, L] for the kernel.
    w_torch_style = jax.random.normal(kw, (L, H), dtype=jnp.float32) * 0.02
    bias = jax.random.normal(kb, (L,), dtype=jnp.float32) * 0.01
    weight = w_torch_style.T  # [H, L]

    y = token_classification_head(x, weight, bias)
    jax.block_until_ready(y)

    # Reference check against plain JAX (eval-mode dropout = identity).
    y_ref = (x.reshape(B * S, H) @ weight + bias).reshape(B, S, L)
    assert y.shape == (B, S, L)
    assert jnp.allclose(y, y_ref, atol=1e-5, rtol=1e-5), "mismatch vs reference"

    print("KERNEL_OK")
</pallas_src>

<mosaic_0001>
module attributes {stable_mosaic.version = 11 : i64} {
  func.func @_head_kernel(%arg0: i32, %arg1: memref<8x32xf32, #tpu.memory_space<vmem>>, %arg2: memref<32x8xf32, #tpu.memory_space<vmem>>, %arg3: memref<1x8xf32, #tpu.memory_space<vmem>>, %arg4: memref<8x8xf32, #tpu.memory_space<vmem>>) attributes {dimension_semantics = [#tpu.dimension_semantics<parallel>], iteration_bounds = array<i64: 2>, scalar_prefetch = 0 : i64, scratch_operands = 0 : i64, tpu.core_type = #tpu.core_type<tc>, window_params = [{transform_indices = @transform_0, window_bounds = array<i64: 8, 32>}, {pipeline_mode = #tpu.pipeline_mode<synchronous>, transform_indices = @transform_1, window_bounds = array<i64: 32, 8>}, {pipeline_mode = #tpu.pipeline_mode<synchronous>, transform_indices = @transform_2, window_bounds = array<i64: 1, 8>}, {transform_indices = @transform_3, window_bounds = array<i64: 8, 8>}]} {
    %c0 = arith.constant 0 : index
    %c0_0 = arith.constant 0 : index
    %0 = vector.load %arg1[%c0, %c0_0] : memref<8x32xf32, #tpu.memory_space<vmem>>, vector<8x32xf32>
    %c0_1 = arith.constant 0 : index
    %c0_2 = arith.constant 0 : index
    %1 = vector.load %arg2[%c0_1, %c0_2] : memref<32x8xf32, #tpu.memory_space<vmem>>, vector<32x8xf32>
    %cst = arith.constant dense<0.000000e+00> : vector<8x8xf32>
    %2 = tpu.matmul %0, %1, %cst {dimension_numbers = #tpu.dot_dimension_numbers<[1], [0], [0], [1], [0, 0, 1, 1], [], []>} : vector<8x32xf32>, vector<32x8xf32>, vector<8x8xf32> -> vector<8x8xf32>
    %c0_3 = arith.constant 0 : index
    %c0_4 = arith.constant 0 : index
    %3 = vector.load %arg3[%c0_3, %c0_4] : memref<1x8xf32, #tpu.memory_space<vmem>>, vector<1x8xf32>
    %4 = vector.broadcast %3 : vector<1x8xf32> to vector<8x8xf32>
    %5 = arith.addf %2, %4 : vector<8x8xf32>
    %c0_5 = arith.constant 0 : index
    %c0_6 = arith.constant 0 : index
    %6 = vector.load %arg4[%c0_5, %c0_6] : memref<8x8xf32, #tpu.memory_space<vmem>>, vector<8x8xf32>
    tpu.vector_store %arg4[%c0_5, %c0_6], %5 {strides = array<i32>} : memref<8x8xf32, #tpu.memory_space<vmem>>, vector<8x8xf32>,
    return
  }
  func.func @transform_0(%arg0: i32) -> (i32, i32) {
    %c0_i32 = arith.constant 0 : i32
    %c0_i32_0 = arith.constant 0 : i32
    return %arg0, %c0_i32 : i32, i32
  }
  func.func @transform_1(%arg0: i32) -> (i32, i32) {
    %c0_i32 = arith.constant 0 : i32
    %c0_i32_0 = arith.constant 0 : i32
    %c0_i32_1 = arith.constant 0 : i32
    return %c0_i32, %c0_i32_0 : i32, i32
  }
  func.func @transform_2(%arg0: i32) -> (i32, i32) {
    %c0_i32 = arith.constant 0 : i32
    %c0_i32_0 = arith.constant 0 : i32
    %c0_i32_1 = arith.constant 0 : i32
    return %c0_i32, %c0_i32_0 : i32, i32
  }
  func.func @transform_3(%arg0: i32) -> (i32, i32) {
    %c0_i32 = arith.constant 0 : i32
    %c0_i32_0 = arith.constant 0 : i32
    return %arg0, %c0_i32 : i32, i32
  }
}

module attributes {stable_mosaic.version = 11 : i64} {
  func.func @_head_kernel(%arg0: i32, %arg1: memref<8x32xf32, #tpu.memory_space<vmem>>, %arg2: memref<32x8xf32, #tpu.memory_space<vmem>>, %arg3: memref<1x8xf32, #tpu.memory_space<vmem>>, %arg4: memref<8x8xf32, #tpu.memory_space<vmem>>) attributes {dimension_semantics = [#tpu.dimension_semantics<parallel>], iteration_bounds = array<i64: 2>, scalar_prefetch = 0 : i64, scratch_operands = 0 : i64, tpu.core_type = #tpu.core_type<tc>, window_params = [{transform_indices = @transform_0, window_bounds = array<i64: 8, 32>}, {pipeline_mode = #tpu.pipeline_mode<synchronous>, transform_indices = @transform_1, window_bounds = array<i64: 32, 8>}, {pipeline_mode = #tpu.pipeline_mode<synchronous>, transform_indices = @transform_2, window_bounds = array<i64: 1, 8>}, {transform_indices = @transform_3, window_bounds = array<i64: 8, 8>}]} {
    %c0 = arith.constant 0 : index
    %c0_0 = arith.constant 0 : index
    %0 = vector.load %arg1[%c0, %c0_0] : memref<8x32xf32, #tpu.memory_space<vmem>>, vector<8x32xf32>
    %c0_1 = arith.constant 0 : index
    %c0_2 = arith.constant 0 : index
    %1 = vector.load %arg2[%c0_1, %c0_2] : memref<32x8xf32, #tpu.memory_space<vmem>>, vector<32x8xf32>
    %cst = arith.constant dense<0.000000e+00> : vector<8x8xf32>
    %2 = tpu.matmul %0, %1, %cst {dimension_numbers = #tpu.dot_dimension_numbers<[1], [0], [0], [1], [0, 0, 1, 1], [], []>} : vector<8x32xf32>, vector<32x8xf32>, vector<8x8xf32> -> vector<8x8xf32>
    %c0_3 = arith.constant 0 : index
    %c0_4 = arith.constant 0 : index
    %3 = vector.load %arg3[%c0_3, %c0_4] : memref<1x8xf32, #tpu.memory_space<vmem>>, vector<1x8xf32>
    %4 = vector.broadcast %3 : vector<1x8xf32> to vector<8x8xf32>
    %5 = arith.addf %2, %4 : vector<8x8xf32>
    %c0_5 = arith.constant 0 : index
    %c0_6 = arith.constant 0 : index
    %6 = vector.load %arg4[%c0_5, %c0_6] : memref<8x8xf32, #tpu.memory_space<vmem>>, vector<8x8xf32>
    tpu.vector_store %arg4[%c0_5, %c0_6], %5 {strides = array<i32>} : memref<8x8xf32, #tpu.memory_space<vmem>>, vector<8x8xf32>,
    return
  }
  func.func @transform_0(%arg0: i32) -> (i32, i32) {
    %c0_i32 = arith.constant 0 : i32
    %c0_i32_0 = arith.constant 0 : i32
    return %arg0, %c0_i32 : i32, i32
  }
  func.func @transform_1(%arg0: i32) -> (i32, i32) {
    %c0_i32 = arith.constant 0 : i32
    %c0_i32_0 = arith.constant 0 : i32
    %c0_i32_1 = arith.constant 0 : i32
    return %c0_i32, %c0_i32_0 : i32, i32
  }
  func.func @transform_2(%arg0: i32) -> (i32, i32) {
    %c0_i32 = arith.constant 0 : i32
    %c0_i32_0 = arith.constant 0 : i32
    %c0_i32_1 = arith.constant 0 : i32
    return %c0_i32, %c0_i32_0 : i32, i32
  }
  func.func @transform_3(%arg0: i32) -> (i32, i32) {
    %c0_i32 = arith.constant 0 : i32
    %c0_i32_0 = arith.constant 0 : i32
    return %arg0, %c0_i32 : i32, i32
  }
}

</mosaic_0001>

<bundles_post_ra>
// kernel: tpu_custom_call.1
= control target key start
LH: loop header
LB: loop body
LE: loop exit
PB: predicated region body
PF: predicated region fallthrough
CT: control target
= control target key end

     0   :  { %s301_s12 = smov 0   ;;  %s333_s0 = inlined_call_operand.vmem [shape: f32[16,32], index: 0, kind: input, shape index: {}]   ;;  %s334_s1 = inlined_call_operand.vmem [shape: f32[32,8], index: 1, kind: input, shape index: {}]   ;;  %s335_s2 = inlined_call_operand.vmem [shape: f32[1,8], index: 2, kind: input, shape index: {}]   ;;  %s336_s3 = inlined_call_operand.vmem [shape: f32[16,8], index: 3, kind: output, shape index: {}]  }
   0x1 LB: > { %s254_s13 = sadd.s32 4294967295, %s279_s12   ;;  %p258_p0 = scmp.ge.s32.totalorder %s279_s12, 1  ;;  %s279_s12 = sphi %s301_s12, %s13_s12  }
   0x2   : > { %p136_p1 = scmp.lt.s32.totalorder %s279_s12, 3 }
   0x4   : > { %p137_p2 = pnand %p258_p0, %p136_p1 }
   0x5   : > { %p158_p3 = scmp.lt.s32.totalorder (!%p137_p2), %s254_s13, 1 }
   0x6   : > { %140 = sbr.rel (%p137_p2) target bundleno = 148 (0x94), region = 32 }
   0xb   : > { %v170_v0 = vld [vmem:[%s334_s1 + $0x18] sm:$0xff]  ;;  %v169_v1 = vld [vmem:[%s334_s1 + $0x10] sm:$0xff]  ;;  %v168_v2 = vld [vmem:[%s334_s1 + $0x8] sm:$0xff]  ;;  %s338_s13 = smov (!%p158_p3, %s254_s13), 1  ;;  %vm175_vm0 = vcmask 261120   ;;  %vm199_vm1 = vcmask 64512  }
   0xc   : > { %191 = vmatpush.msra.mxu0 %v170_v0  ;;  %v167_v3 = vld [vmem:[%s334_s1] sm:$0xff]  ;;  %s259_s22 = sshll.u32 %s338_s13, 3 }
   0xd   : > { %s161_s25 = scalar_lea.vmem %s333_s0, %s259_s22  ;;  %v272_v5 = vld [vmem:[%s335_s2] ss:$0 sm:$0xff]  ;;  %s165_s30 = scalar_lea.vmem %s336_s3, %s259_s22 }
   0xe   : > { %192 = vmatpush.msra.mxu0 %v169_v1  ;;  %v166_v4 = vld [vmem:[%s161_s25] sm:$0xff] }
  0x10   : > { %193 = vmatpush.msra.mxu0 %v168_v2 }
  0x12   : > { %194 = vmatpush.msra.mxu0 %v167_v3 }
  0x13   : > { %261 = vmatmul.msk.f32.vlgmr.msra.gmra.mxu0 %vm175_vm0, %v166_v4 }
  0x90   : > { %v196_v6 = vpop.f32.mrf.mxu0 }
  0x91   : > { %v197_v7 = vadd.f32 %v272_v5, %v196_v6 }
  0x93   : > { %200 = vst.msk [vmem:[%s165_s30] sm:$0xff] %vm199_vm1, %v197_v7 }
  0x94 PF: > { %s13_s12 = sadd.s32 1, %s279_s12  }
  0x95   : > { %p10_p4 = scmp.ge.s32.totalorder %s13_s12, 4  }
  0x97   :  { %12 = sbr.rel (!%p10_p4) target bundleno = 1 (0x1), region = 62 }

// kernel: tpu_custom_call.1
= control target key start
LH: loop header
LB: loop body
LE: loop exit
PB: predicated region body
PF: predicated region fallthrough
CT: control target
= control target key end

     0   :  { %s301_s12 = smov 0   ;;  %s333_s0 = inlined_call_operand.vmem [shape: f32[16,32], index: 0, kind: input, shape index: {}]   ;;  %s334_s1 = inlined_call_operand.vmem [shape: f32[32,8], index: 1, kind: input, shape index: {}]   ;;  %s335_s2 = inlined_call_operand.vmem [shape: f32[1,8], index: 2, kind: input, shape index: {}]   ;;  %s336_s3 = inlined_call_operand.vmem [shape: f32[16,8], index: 3, kind: output, shape index: {}]  }
   0x1 LB: > { %s254_s13 = sadd.s32 4294967295, %s279_s12   ;;  %p258_p0 = scmp.ge.s32.totalorder %s279_s12, 1  ;;  %s279_s12 = sphi %s301_s12, %s13_s12  }
   0x2   : > { %p136_p1 = scmp.lt.s32.totalorder %s279_s12, 3 }
   0x4   : > { %p137_p2 = pnand %p258_p0, %p136_p1 }
   0x5   : > { %p158_p3 = scmp.lt.s32.totalorder (!%p137_p2), %s254_s13, 1 }
   0x6   : > { %140 = sbr.rel (%p137_p2) target bundleno = 148 (0x94), region = 32 }
   0xb   : > { %v170_v0 = vld [vmem:[%s334_s1 + $0x18] sm:$0xff]  ;;  %v169_v1 = vld [vmem:[%s334_s1 + $0x10] sm:$0xff]  ;;  %v168_v2 = vld [vmem:[%s334_s1 + $0x8] sm:$0xff]  ;;  %s338_s13 = smov (!%p158_p3, %s254_s13), 1  ;;  %vm175_vm0 = vcmask 261120   ;;  %vm199_vm1 = vcmask 64512  }
   0xc   : > { %191 = vmatpush.msra.mxu0 %v170_v0  ;;  %v167_v3 = vld [vmem:[%s334_s1] sm:$0xff]  ;;  %s259_s22 = sshll.u32 %s338_s13, 3 }
   0xd   : > { %s161_s25 = scalar_lea.vmem %s333_s0, %s259_s22  ;;  %v272_v5 = vld [vmem:[%s335_s2] ss:$0 sm:$0xff]  ;;  %s165_s30 = scalar_lea.vmem %s336_s3, %s259_s22 }
   0xe   : > { %192 = vmatpush.msra.mxu0 %v169_v1  ;;  %v166_v4 = vld [vmem:[%s161_s25] sm:$0xff] }
  0x10   : > { %193 = vmatpush.msra.mxu0 %v168_v2 }
  0x12   : > { %194 = vmatpush.msra.mxu0 %v167_v3 }
  0x13   : > { %261 = vmatmul.msk.f32.vlgmr.msra.gmra.mxu0 %vm175_vm0, %v166_v4 }
  0x90   : > { %v196_v6 = vpop.f32.mrf.mxu0 }
  0x91   : > { %v197_v7 = vadd.f32 %v272_v5, %v196_v6 }
  0x93   : > { %200 = vst.msk [vmem:[%s165_s30] sm:$0xff] %vm199_vm1, %v197_v7 }
  0x94 PF: > { %s13_s12 = sadd.s32 1, %s279_s12  }
  0x95   : > { %p10_p4 = scmp.ge.s32.totalorder %s13_s12, 4  }
  0x97   :  { %12 = sbr.rel (!%p10_p4) target bundleno = 1 (0x1), region = 62 }

</bundles_post_ra>
